<compile_context>
chip_gen: v7x
topology: tpu7x:2x2x1
jax: 0.10.0
libtpu: 0.0.40
codegen_flags: <defaults>
</compile_context>

<pallas_src>
import functools
import math

import jax
import jax.numpy as jnp
from jax.experimental import pallas as pl
from jax.experimental.pallas import tpu as pltpu


# ----------------------------------------------------------------------------
# Fused 3-layer 1x1-conv (per-pixel MLP) kernel.
# ----------------------------------------------------------------------------
def _pixel_disc_kernel(x_ref, w1_ref, b1_ref, w2_ref, b2_ref, w3_ref, o_ref,
                       *, slope):
    # Layer 1: 1x1 conv (Cin_pad -> ndf) + bias, LeakyReLU.
    x = x_ref[...].astype(jnp.bfloat16)
    h = jnp.dot(x, w1_ref[...], preferred_element_type=jnp.float32)
    h = h + b1_ref[...]
    h = jnp.where(h >= 0.0, h, slope * h)

    # Layer 2: 1x1 conv (ndf -> 2*ndf) with BatchNorm folded into the weights
    # (scale) and bias (beta), LeakyReLU.
    h = jnp.dot(h.astype(jnp.bfloat16), w2_ref[...],
                preferred_element_type=jnp.float32)
    h = h + b2_ref[...]
    h = jnp.where(h >= 0.0, h, slope * h)

    # Layer 3: 1x1 conv (2*ndf -> 2), no bias.
    o_ref[...] = jnp.dot(h.astype(jnp.bfloat16), w3_ref[...],
                         preferred_element_type=jnp.float32)


# ----------------------------------------------------------------------------
# Wrapper: NCHW in -> (NCHW channel 0, NCHW channel 1) out.
# ----------------------------------------------------------------------------
def pixel_discriminator_aux_forward(params, x_nchw, *, tile_m=256):
    n, c, h, w = x_nchw.shape
    w1, b1 = params["w1"], params["b1"]
    w2, b2 = params["w2"], params["b2"]
    w3 = params["w3"]
    cin_pad = w1.shape[0]
    ndf = w1.shape[1]
    cmid = w2.shape[1]
    cout = w3.shape[1]

    # Flatten pixels; pad channels to the (zero-padded) weight Cin and pad the
    # pixel count up to a multiple of the row tile.
    x = jnp.transpose(x_nchw, (0, 2, 3, 1)).astype(jnp.float32)   # NHWC
    m = n * h * w
    x = x.reshape(m, c)
    if c < cin_pad:
        x = jnp.pad(x, ((0, 0), (0, cin_pad - c)))
    m_pad = pl.cdiv(m, tile_m) * tile_m
    if m_pad != m:
        x = jnp.pad(x, ((0, m_pad - m), (0, 0)))

    kernel = functools.partial(_pixel_disc_kernel, slope=0.2)

    out = pl.pallas_call(
        kernel,
        out_shape=jax.ShapeDtypeStruct((m_pad, cout), jnp.float32),
        grid=(m_pad // tile_m,),
        in_specs=[
            pl.BlockSpec((tile_m, cin_pad), lambda i: (i, 0)),
            pl.BlockSpec((cin_pad, ndf), lambda i: (0, 0)),
            pl.BlockSpec((1, ndf), lambda i: (0, 0)),
            pl.BlockSpec((ndf, cmid), lambda i: (0, 0)),
            pl.BlockSpec((1, cmid), lambda i: (0, 0)),
            pl.BlockSpec((cmid, cout), lambda i: (0, 0)),
        ],
        out_specs=pl.BlockSpec((tile_m, cout), lambda i: (i, 0)),
        compiler_params=pltpu.CompilerParams(
            dimension_semantics=("parallel",)),
    )(x, w1, b1, w2, b2, w3)

    out = out[:m].reshape(n, h, w, cout)
    out = jnp.transpose(out, (0, 3, 1, 2))                         # NCHW (2 ch)
    return out[:, 0:1, :, :], out[:, 1:2, :, :]


# ----------------------------------------------------------------------------
# Deterministic synthetic parameters (no checkpoint load).
# ----------------------------------------------------------------------------
def init_pixel_discriminator_params(key, input_nc=1, ndf=64):
    eps = 1e-3  # BatchNorm2d branch of the reference module.
    k1, k2, k3, k4, k5, k6 = jax.random.split(key, 6)

    cin_pad = max(8, ((input_nc + 7) // 8) * 8)

    # Conv1 (1x1, bias=True).
    w1 = (1.0 / math.sqrt(input_nc)) * jax.random.normal(
        k1, (input_nc, ndf), jnp.float32)
    b1 = 0.05 * jax.random.normal(k2, (1, ndf), jnp.float32)
    w1 = jnp.pad(w1, ((0, cin_pad - input_nc), (0, 0)))

    # Conv2 (1x1, bias=False) followed by BatchNorm2d(2*ndf, eps, affine=True).
    w2 = (1.0 / math.sqrt(ndf)) * jax.random.normal(
        k3, (ndf, 2 * ndf), jnp.float32)
    gamma = 1.0 + 0.05 * jax.random.normal(k4, (2 * ndf,), jnp.float32)
    beta = 0.05 * jax.random.normal(k5, (2 * ndf,), jnp.float32)
    # Inference-mode BN (running mean=0, var=1) folded into weights + bias.
    scale = gamma / jnp.sqrt(1.0 + eps)
    w2 = w2 * scale[None, :]
    b2 = beta[None, :]

    # Conv3 (1x1, bias=False) -> 2 output channels.
    w3 = (1.0 / math.sqrt(2 * ndf)) * jax.random.normal(
        k6, (2 * ndf, 2), jnp.float32)

    return {
        "w1": w1.astype(jnp.bfloat16), "b1": b1,
        "w2": w2.astype(jnp.bfloat16), "b2": b2,
        "w3": w3.astype(jnp.bfloat16),
    }


# ----------------------------------------------------------------------------
# Pure-JAX reference (same bf16 weights / bf16 activation casts, f32 accum).
# ----------------------------------------------------------------------------
def _reference_forward(params, x_nchw, slope=0.2):
    n, c, h, w = x_nchw.shape
    cin_pad = params["w1"].shape[0]
    x = jnp.transpose(x_nchw, (0, 2, 3, 1)).reshape(-1, c).astype(jnp.float32)
    x = jnp.pad(x, ((0, 0), (0, cin_pad - c)))

    a = jnp.dot(x.astype(jnp.bfloat16), params["w1"],
                preferred_element_type=jnp.float32) + params["b1"]
    a = jnp.where(a >= 0.0, a, slope * a)
    a = jnp.dot(a.astype(jnp.bfloat16), params["w2"],
                preferred_element_type=jnp.float32) + params["b2"]
    a = jnp.where(a >= 0.0, a, slope * a)
    o = jnp.dot(a.astype(jnp.bfloat16), params["w3"],
                preferred_element_type=jnp.float32)
    o = jnp.transpose(o.reshape(n, h, w, 2), (0, 3, 1, 2))
    return o[:, 0:1, :, :], o[:, 1:2, :, :]


if __name__ == "__main__":
    key = jax.random.PRNGKey(0)
    pkey, xkey = jax.random.split(key)

    input_nc = 1
    params = init_pixel_discriminator_params(pkey, input_nc=input_nc, ndf=64)
    # NCHW input, like the PyTorch module (default input_nc=1).
    x = jax.random.normal(xkey, (2, input_nc, 16, 16), jnp.float32)

    fwd = jax.jit(pixel_discriminator_aux_forward)
    out0, out1 = jax.block_until_ready(fwd(params, x))

    assert out0.shape == (2, 1, 16, 16), out0.shape
    assert out1.shape == (2, 1, 16, 16), out1.shape
    assert bool(jnp.all(jnp.isfinite(out0)))
    assert bool(jnp.all(jnp.isfinite(out1)))

    ref0, ref1 = _reference_forward(params, x)
    assert bool(jnp.allclose(out0, ref0, atol=5e-2, rtol=5e-2))
    assert bool(jnp.allclose(out1, ref1, atol=5e-2, rtol=5e-2))

    print("KERNEL_OK")
</pallas_src>

<mosaic_0001>
module attributes {stable_mosaic.version = 11 : i64} {
  func.func @_pixel_disc_kernel(%arg0: i32, %arg1: memref<256x8xf32, #tpu.memory_space<vmem>>, %arg2: memref<8x64xbf16, #tpu.memory_space<vmem>>, %arg3: memref<1x64xf32, #tpu.memory_space<vmem>>, %arg4: memref<64x128xbf16, #tpu.memory_space<vmem>>, %arg5: memref<1x128xf32, #tpu.memory_space<vmem>>, %arg6: memref<128x2xbf16, #tpu.memory_space<vmem>>, %arg7: memref<256x2xf32, #tpu.memory_space<vmem>>) attributes {dimension_semantics = [#tpu.dimension_semantics<parallel>], iteration_bounds = array<i64: 2>, scalar_prefetch = 0 : i64, scratch_operands = 0 : i64, tpu.core_type = #tpu.core_type<tc>, window_params = [{transform_indices = @transform_0, window_bounds = array<i64: 256, 8>}, {pipeline_mode = #tpu.pipeline_mode<synchronous>, transform_indices = @transform_1, window_bounds = array<i64: 8, 64>}, {pipeline_mode = #tpu.pipeline_mode<synchronous>, transform_indices = @transform_2, window_bounds = array<i64: 1, 64>}, {pipeline_mode = #tpu.pipeline_mode<synchronous>, transform_indices = @transform_3, window_bounds = array<i64: 64, 128>}, {pipeline_mode = #tpu.pipeline_mode<synchronous>, transform_indices = @transform_4, window_bounds = array<i64: 1, 128>}, {pipeline_mode = #tpu.pipeline_mode<synchronous>, transform_indices = @transform_5, window_bounds = array<i64: 128, 2>}, {transform_indices = @transform_6, window_bounds = array<i64: 256, 2>}]} {
    %c0 = arith.constant 0 : index
    %c0_0 = arith.constant 0 : index
    %0 = vector.load %arg1[%c0, %c0_0] : memref<256x8xf32, #tpu.memory_space<vmem>>, vector<256x8xf32>
    %1 = arith.truncf %0 : vector<256x8xf32> to vector<256x8xbf16>
    %c0_1 = arith.constant 0 : index
    %c0_2 = arith.constant 0 : index
    %2 = vector.load %arg2[%c0_1, %c0_2] : memref<8x64xbf16, #tpu.memory_space<vmem>>, vector<8x64xbf16>
    %cst = arith.constant dense<0.000000e+00> : vector<256x64xf32>
    %3 = tpu.matmul %1, %2, %cst {dimension_numbers = #tpu.dot_dimension_numbers<[1], [0], [0], [1], [0, 0, 1, 1], [], []>} : vector<256x8xbf16>, vector<8x64xbf16>, vector<256x64xf32> -> vector<256x64xf32>
    %c0_3 = arith.constant 0 : index
    %c0_4 = arith.constant 0 : index
    %4 = vector.load %arg3[%c0_3, %c0_4] : memref<1x64xf32, #tpu.memory_space<vmem>>, vector<1x64xf32>
    %5 = vector.broadcast %4 : vector<1x64xf32> to vector<256x64xf32>
    %6 = arith.addf %3, %5 : vector<256x64xf32>
    %cst_5 = arith.constant 0.000000e+00 : f32
    %7 = vector.broadcast %cst_5 : f32 to vector<256x64xf32>
    %8 = arith.cmpf oge, %6, %7 : vector<256x64xf32>
    %cst_6 = arith.constant 2.000000e-01 : f32
    %9 = vector.broadcast %cst_6 : f32 to vector<256x64xf32>
    %10 = arith.mulf %9, %6 : vector<256x64xf32>
    %11 = arith.select %8, %6, %10 : vector<256x64xi1>, vector<256x64xf32>
    %12 = arith.truncf %11 : vector<256x64xf32> to vector<256x64xbf16>
    %c0_7 = arith.constant 0 : index
    %c0_8 = arith.constant 0 : index
    %13 = vector.load %arg4[%c0_7, %c0_8] : memref<64x128xbf16, #tpu.memory_space<vmem>>, vector<64x128xbf16>
    %cst_9 = arith.constant dense<0.000000e+00> : vector<256x128xf32>
    %14 = tpu.matmul %12, %13, %cst_9 {dimension_numbers = #tpu.dot_dimension_numbers<[1], [0], [0], [1], [0, 0, 1, 1], [], []>} : vector<256x64xbf16>, vector<64x128xbf16>, vector<256x128xf32> -> vector<256x128xf32>
    %c0_10 = arith.constant 0 : index
    %c0_11 = arith.constant 0 : index
    %15 = vector.load %arg5[%c0_10, %c0_11] : memref<1x128xf32, #tpu.memory_space<vmem>>, vector<1x128xf32>
    %16 = vector.broadcast %15 : vector<1x128xf32> to vector<256x128xf32>
    %17 = arith.addf %14, %16 : vector<256x128xf32>
    %cst_12 = arith.constant 0.000000e+00 : f32
    %18 = vector.broadcast %cst_12 : f32 to vector<256x128xf32>
    %19 = arith.cmpf oge, %17, %18 : vector<256x128xf32>
    %cst_13 = arith.constant 2.000000e-01 : f32
    %20 = vector.broadcast %cst_13 : f32 to vector<256x128xf32>
    %21 = arith.mulf %20, %17 : vector<256x128xf32>
    %22 = arith.select %19, %17, %21 : vector<256x128xi1>, vector<256x128xf32>
    %23 = arith.truncf %22 : vector<256x128xf32> to vector<256x128xbf16>
    %c0_14 = arith.constant 0 : index
    %c0_15 = arith.constant 0 : index
    %24 = vector.load %arg6[%c0_14, %c0_15] : memref<128x2xbf16, #tpu.memory_space<vmem>>, vector<128x2xbf16>
    %cst_16 = arith.constant dense<0.000000e+00> : vector<256x2xf32>
    %25 = tpu.matmul %23, %24, %cst_16 {dimension_numbers = #tpu.dot_dimension_numbers<[1], [0], [0], [1], [0, 0, 1, 1], [], []>} : vector<256x128xbf16>, vector<128x2xbf16>, vector<256x2xf32> -> vector<256x2xf32>
    %c0_17 = arith.constant 0 : index
    %c0_18 = arith.constant 0 : index
    %26 = vector.load %arg7[%c0_17, %c0_18] : memref<256x2xf32, #tpu.memory_space<vmem>>, vector<256x2xf32>
    tpu.vector_store %arg7[%c0_17, %c0_18], %25 {strides = array<i32>} : memref<256x2xf32, #tpu.memory_space<vmem>>, vector<256x2xf32>,
    return
  }
  func.func @transform_0(%arg0: i32) -> (i32, i32) {
    %c0_i32 = arith.constant 0 : i32
    %c0_i32_0 = arith.constant 0 : i32
    return %arg0, %c0_i32 : i32, i32
  }
  func.func @transform_1(%arg0: i32) -> (i32, i32) {
    %c0_i32 = arith.constant 0 : i32
    %c0_i32_0 = arith.constant 0 : i32
    %c0_i32_1 = arith.constant 0 : i32
    return %c0_i32, %c0_i32_0 : i32, i32
  }
  func.func @transform_2(%arg0: i32) -> (i32, i32) {
    %c0_i32 = arith.constant 0 : i32
    %c0_i32_0 = arith.constant 0 : i32
    %c0_i32_1 = arith.constant 0 : i32
    return %c0_i32, %c0_i32_0 : i32, i32
  }
  func.func @transform_3(%arg0: i32) -> (i32, i32) {
    %c0_i32 = arith.constant 0 : i32
    %c0_i32_0 = arith.constant 0 : i32
    %c0_i32_1 = arith.constant 0 : i32
    return %c0_i32, %c0_i32_0 : i32, i32
  }
  func.func @transform_4(%arg0: i32) -> (i32, i32) {
    %c0_i32 = arith.constant 0 : i32
    %c0_i32_0 = arith.constant 0 : i32
    %c0_i32_1 = arith.constant 0 : i32
    return %c0_i32, %c0_i32_0 : i32, i32
  }
  func.func @transform_5(%arg0: i32) -> (i32, i32) {
    %c0_i32 = arith.constant 0 : i32
    %c0_i32_0 = arith.constant 0 : i32
    %c0_i32_1 = arith.constant 0 : i32
    return %c0_i32, %c0_i32_0 : i32, i32
  }
  func.func @transform_6(%arg0: i32) -> (i32, i32) {
    %c0_i32 = arith.constant 0 : i32
    %c0_i32_0 = arith.constant 0 : i32
    return %arg0, %c0_i32 : i32, i32
  }
}

</mosaic_0001>

<bundles_post_ra>
// kernel: pixel_discriminator_aux_forward.1
= control target key start
LH: loop header
LB: loop body
LE: loop exit
PB: predicated region body
PF: predicated region fallthrough
CT: control target
= control target key end

     0   :  { %s1620_s21 = smov 0   ;;  %s1920_s0 = inlined_call_operand.vmem [shape: f32[512,8], index: 0, kind: input, shape index: {}]   ;;  %s1921_s1 = inlined_call_operand.vmem [shape: bf16[8,64], index: 1, kind: input, shape index: {}]   ;;  %s1922_s2 = inlined_call_operand.vmem [shape: f32[1,64], index: 2, kind: input, shape index: {}]   ;;  %s1923_s3 = inlined_call_operand.vmem [shape: bf16[64,128], index: 3, kind: input, shape index: {}]   ;;  %s1924_s4 = inlined_call_operand.vmem [shape: f32[1,128], index: 4, kind: input, shape index: {}]   ;;  %s1925_s5 = inlined_call_operand.vmem [shape: bf16[128,2], index: 5, kind: input, shape index: {}]   ;;  %s1926_s6 = inlined_call_operand.vmem [shape: f32[512,2], index: 6, kind: output, shape index: {}]  }
   0x1 LB: > { %s1313_s22 = sadd.s32 4294967295, %s1583_s21   ;;  %p1317_p0 = scmp.ge.s32.totalorder %s1583_s21, 1  ;;  %s1583_s21 = sphi %s1620_s21, %s16_s21  }
   0x2   : > { %p213_p1 = scmp.lt.s32.totalorder %s1583_s21, 3 }
   0x4   : > { %p214_p2 = pnand %p1317_p0, %p213_p1 }
   0x5   : > { %v304_v0 = vld [vmem:[%s1921_s1] sm:$0xf] (!%p214_p2)  ;;  %vm361_vm0 = vcmask (!%p214_p2), 1043456   ;;  %s1318_s25 = sshll.u32 (!%p214_p2), %s1313_s22, 5  ;;  %vm312_vm1 = vcmask (!%p214_p2), 64512   ;;  %v1566_v24 = vld [vmem:[%s1923_s3 + $0x8] sm:$0xff] (!%p214_p2)  }
   0x6   : > { %217 = sbr.rel (%p214_p2) target bundleno = 738 (0x2e2), region = 44  ;;  %v1565_v1 = vld [vmem:[%s1923_s3] sm:$0xff] (!%p214_p2)   ;;  %1555 = vmatprep.subr.msk.bf16.mxu0 (!%p214_p2), %vm361_vm0, %v304_v0  ;;  %v363_v2 = vsel (!%p214_p2), %vm361_vm0, %v304_v0, 0  ;;  %p244_p3 = scmp.lt.s32.totalorder (!%p214_p2), %s1318_s25, 63  ;;  %1556 = vmatprep.subr.msk.bf16.mxu1 (!%p214_p2), %vm361_vm0, %v304_v0  ;;  %v1567_v30 = vld [vmem:[%s1923_s3 + $0x10] sm:$0xff] (!%p214_p2)   ;;  %v1568_v53 = vld [vmem:[%s1923_s3 + $0x18] sm:$0xff] (!%p214_p2)  }
   0x7   : > { %1432 = vmatpush3.bf16.msra.mxu0 (!%p214_p2), %v363_v2  ;;  %1554 = vmatpush3.bf16.msra.mxu1 (!%p214_p2), %v363_v2  ;;  %v1569_v54 = vld [vmem:[%s1925_s5] sm:$0xff] (!%p214_p2)   ;;  %v1570_v55 = vld [vmem:[%s1925_s5 + $0x8] sm:$0xff] (!%p214_p2)   ;;  %v1571_v56 = vld [vmem:[%s1925_s5 + $0x10] sm:$0xff] (!%p214_p2)   ;;  %vm677_vm6 = vcmask (!%p214_p2), 523264  }
   0x8   : > { %1465 = vmatprep.subr.bf16.mxu1 (!%p214_p2), %v1565_v1  ;;  %1505 = vmatprep.subr.bf16.mxu0 (!%p214_p2), %v1569_v54  ;;  %v1572_v57 = vld [vmem:[%s1925_s5 + $0x18] sm:$0xff] (!%p214_p2)   ;;  %v1573_v58 = vld [vmem:[%s1925_s5 + $0x20] sm:$0xff] (!%p214_p2)   ;;  %v1574_v59 = vld [vmem:[%s1925_s5 + $0x28] sm:$0xff] (!%p214_p2)  }
   0x9   : > { %v1722_v60 = vld [vmem:[%s1922_s2] ss:$0 sm:$0xff] (!%p214_p2) }
   0xd   : > { %s1928_s25 = smov (!%p244_p3, %s1318_s25), 63 }
   0xe   : > { %s1319_s28 = sshll.u32 %s1928_s25, 3 }
   0xf   : > { %s1642_s7 = scalar_lea.vmem %s1920_s0, %s1319_s28  ;;  %s1851_s15 = scalar_lea.vmem %s1926_s6, %s1319_s28 }
  0x10   : > { %v256_v3 = vld [vmem:[%s1642_s7] sm:$0xff]  ;;  %v257_v4 = vld [vmem:[%s1642_s7 + $0x8] sm:$0xff]  ;;  %v258_v5 = vld [vmem:[%s1642_s7 + $0x10] sm:$0xff] }
  0x11   : > { %v288_v6 = vpack.c.bf16 %v257_v4, %v256_v3  ;;  %v259_v7 = vld [vmem:[%s1642_s7 + $0x18] sm:$0xff]  ;;  %v260_v8 = vld [vmem:[%s1642_s7 + $0x20] sm:$0xff]  ;;  %v261_v9 = vld [vmem:[%s1642_s7 + $0x28] sm:$0xff] }
  0x12   : > { %v289_v10 = vpack.c.bf16 %v259_v7, %v258_v5  ;;  %v290_v11 = vpack.c.bf16 %v261_v9, %v260_v8  ;;  %v262_v12 = vld [vmem:[%s1642_s7 + $0x30] sm:$0xff]  ;;  %v263_v13 = vld [vmem:[%s1642_s7 + $0x38] sm:$0xff]  ;;  %v264_v14 = vld [vmem:[%s1642_s7 + $0x40] sm:$0xff] }
  0x13   : > { %1433 = vmatprep.mubr.msk.bf16.mxu0 %vm312_vm1, %v288_v6  ;;  %v265_v15 = vld [vmem:[%s1642_s7 + $0x48] sm:$0xff]  ;;  %v272_v16 = vld [vmem:[%s1642_s7 + $0x80] sm:$0xff]  ;;  %v274_v19 = vld [vmem:[%s1642_s7 + $0x90] sm:$0xff]  ;;  %v291_v25 = vpack.c.bf16 %v263_v13, %v262_v12 }
  0x14   : > { %1434 = vmatmul.mubr.msk.bf16.vlgmr.msra.gmra.mrb[0].mxu0 %vm312_vm1, %v289_v10  ;;  %v273_v17 = vld [vmem:[%s1642_s7 + $0x88] sm:$0xff]  ;;  %v275_v20 = vld [vmem:[%s1642_s7 + $0x98] sm:$0xff]  ;;  %v276_v21 = vld [vmem:[%s1642_s7 + $0xa0] sm:$0xff]  ;;  %v292_v27 = vpack.c.bf16 %v265_v15, %v264_v14 }
  0x15   : > { %1437 = vmatprep.mubr.msk.bf16.mxu0 %vm312_vm1, %v290_v11  ;;  %v296_v18 = vpack.c.bf16 %v273_v17, %v272_v16  ;;  %v297_v22 = vpack.c.bf16 %v275_v20, %v274_v19  ;;  %v277_v23 = vld [vmem:[%s1642_s7 + $0xa8] sm:$0xff]  ;;  %v278_v28 = vld [vmem:[%s1642_s7 + $0xb0] sm:$0xff]  ;;  %v279_v29 = vld [vmem:[%s1642_s7 + $0xb8] sm:$0xff]  ;;  %1506 = vmatpush3.bf16.msra.mxu0 %v1569_v54 }
  0x16   : > { %v298_v26 = vpack.c.bf16 %v277_v23, %v276_v21  ;;  %v280_v31 = vld [vmem:[%s1642_s7 + $0xc0] sm:$0xff]  ;;  %v281_v32 = vld [vmem:[%s1642_s7 + $0xc8] sm:$0xff]  ;;  %v266_v33 = vld [vmem:[%s1642_s7 + $0x50] sm:$0xff]  ;;  %v299_v35 = vpack.c.bf16 %v279_v29, %v278_v28  ;;  %1507 = vmatprep.subr.bf16.mxu0 %v1570_v55 }
  0x17   : > { %1449 = vmatprep.mubr.msk.bf16.mxu1 %vm312_vm1, %v296_v18  ;;  %v267_v34 = vld [vmem:[%s1642_s7 + $0x58] sm:$0xff]  ;;  %v268_v36 = vld [vmem:[%s1642_s7 + $0x60] sm:$0xff]  ;;  %v269_v37 = vld [vmem:[%s1642_s7 + $0x68] sm:$0xff]  ;;  %v300_v38 = vpack.c.bf16 %v281_v32, %v280_v31 }
  0x18   : > { %1450 = vmatmul.mubr.msk.bf16.vlgmr.msra.gmra.mrb[0].mxu1 %vm312_vm1, %v297_v22  ;;  %v293_v39 = vpack.c.bf16 %v267_v34, %v266_v33  ;;  %v294_v40 = vpack.c.bf16 %v269_v37, %v268_v36  ;;  %v282_v41 = vld [vmem:[%s1642_s7 + $0xd0] sm:$0xff]  ;;  %v283_v42 = vld [vmem:[%s1642_s7 + $0xd8] sm:$0xff]  ;;  %v284_v43 = vld [vmem:[%s1642_s7 + $0xe0] sm:$0xff] }
  0x19   : > { %1453 = vmatprep.mubr.msk.bf16.mxu1 %vm312_vm1, %v298_v26  ;;  %1466 = vmatpush3.bf16.msra.mxu1 %v1565_v1  ;;  %v285_v44 = vld [vmem:[%s1642_s7 + $0xe8] sm:$0xff]  ;;  %v270_v45 = vld [vmem:[%s1642_s7 + $0x70] sm:$0xff]  ;;  %v271_v46 = vld [vmem:[%s1642_s7 + $0x78] sm:$0xff]  ;;  %v301_v47 = vpack.c.bf16 %v283_v42, %v282_v41 }
  0x1a   : > { %1467 = vmatprep.subr.bf16.mxu1 %v1566_v24  ;;  %v302_v48 = vpack.c.bf16 %v285_v44, %v284_v43  ;;  %v295_v49 = vpack.c.bf16 %v271_v46, %v270_v45  ;;  %v286_v50 = vld [vmem:[%s1642_s7 + $0xf0] sm:$0xff]  ;;  %v287_v51 = vld [vmem:[%s1642_s7 + $0xf8] sm:$0xff]  ;;  %1508 = vmatpush3.bf16.msra.mxu0 %v1570_v55 }
  0x1b   : > { %v303_v52 = vpack.c.bf16 %v287_v51, %v286_v50  ;;  %1509 = vmatprep.subr.bf16.mxu0 %v1571_v56 }
  0x1c   : > { %1438 = vmatmul.mubr.msk.bf16.gmra.mrb[4].mxu0 %vm312_vm1, %v291_v25 }
  0x1d   : > { %1441 = vmatprep.mubr.msk.bf16.mxu0 %vm312_vm1, %v292_v27  ;;  %1468 = vmatpush3.bf16.msra.mxu1 %v1566_v24 }
  0x1e   : > { %1469 = vmatprep.subr.bf16.mxu1 %v1567_v30  ;;  %1510 = vmatpush3.bf16.msra.mxu0 %v1571_v56 }
  0x1f   : > { %1511 = vmatprep.subr.bf16.mxu0 %v1572_v57 }
  0x20   : > { %1454 = vmatmul.mubr.msk.bf16.gmra.mrb[4].mxu1 %vm312_vm1, %v299_v35 }
  0x21   : > { %1457 = vmatprep.mubr.msk.bf16.mxu1 %vm312_vm1, %v300_v38  ;;  %1470 = vmatpush3.bf16.msra.mxu1 %v1567_v30 }
  0x22   : > { %1471 = vmatprep.subr.bf16.mxu1 %v1568_v53  ;;  %1512 = vmatpush3.bf16.msra.mxu0 %v1572_v57 }
  0x23   : > { %1513 = vmatprep.subr.bf16.mxu0 %v1573_v58 }
  0x24   : > { %1442 = vmatmul.mubr.msk.bf16.gmra.mrb[8].mxu0 %vm312_vm1, %v293_v39 }
  0x25   : > { %1445 = vmatprep.mubr.msk.bf16.mxu0 %vm312_vm1, %v294_v40  ;;  %1472 = vmatpush3.bf16.msra.mxu1 %v1568_v53 }
  0x26   : > { %1514 = vmatpush3.bf16.msra.mxu0 %v1573_v58 }
  0x27   : > { %1515 = vmatprep.subr.bf16.mxu0 %v1574_v59 }
  0x28   : > { %1458 = vmatmul.mubr.msk.bf16.gmra.mrb[8].mxu1 %vm312_vm1, %v301_v47 }
  0x29   : > { %1461 = vmatprep.mubr.msk.bf16.mxu1 %vm312_vm1, %v302_v48 }
  0x2a   : > { %1516 = vmatpush3.bf16.msra.mxu0 %v1574_v59 }
  0x2c   : > { %1446 = vmatmul.mubr.msk.bf16.gmra.mrb[12].mxu0 %vm312_vm1, %v295_v49 }
  0x30   : > { %1462 = vmatmul.mubr.msk.bf16.gmra.mrb[12].mxu1 %vm312_vm1, %v303_v52 }
  0xe7   : > { %v1435_v61 = vpop.f32.mrb[0].mxu0 }
  0xe8   : > { %v408_v62 = vadd.f32 %v1435_v61, %v1722_v60  ;;  %v399_v63 = vpop.f32.mrb[1].mxu0 }
  0xe9   : > { %v400_v0 = vadd.f32 %v1722_v60, %v399_v63  ;;  %v1436_v1 = vpop.f32.mrb[2].mxu0 }
  0xea   : > { %v560_v2 = vmul.f32 0.2, %v408_v62  ;;  %v411_v3 = vadd.f32 %v1436_v1, %v1722_v60  ;;  %v402_v4 = vpop.f32.mrb[3].mxu0  ;;  %vm528_vm2 = vcmp.ge.f32.partialorder %v408_v62, 0.0 }
  0xeb   : > { %vm526_vm3 = vcmp.ge.f32.partialorder %v400_v0, 0.0  ;;  %v558_v5 = vmul.f32 0.2, %v400_v0  ;;  %v403_v6 = vadd.f32 %v1722_v60, %v402_v4  ;;  %v1451_v8 = vpop.f32.mrb[0].mxu1 }
  0xec   : > { %vm529_vm4 = vcmp.ge.f32.partialorder %v411_v3, 0.0  ;;  %v561_v7 = vmul.f32 0.2, %v411_v3  ;;  %v472_v10 = vadd.f32 %v1451_v8, %v1722_v60  ;;  %v463_v11 = vpop.f32.mrb[1].mxu1  ;;  %v592_v12 = vsel %vm528_vm2, %v408_v62, %v560_v2 }
  0xed   : > { %vm527_vm5 = vcmp.ge.f32.partialorder %v403_v6, 0.0  ;;  %v559_v9 = vmul.f32 0.2, %v403_v6  ;;  %v590_v13 = vsel %vm526_vm3, %v400_v0, %v558_v5  ;;  %v464_v15 = vadd.f32 %v1722_v60, %v463_v11  ;;  %v1452_v16 = vpop.f32.mrb[2].mxu1 }
  0xee   : > { %v593_v14 = vsel %vm529_vm4, %v411_v3, %v561_v7  ;;  %vm544_vm7 = vcmp.ge.f32.partialorder %v472_v10, 0.0  ;;  %v576_v20 = vmul.f32 0.2, %v472_v10  ;;  %v466_v21 = vpop.f32.mrb[3].mxu1  ;;  %v475_v29 = vadd.f32 %v1452_v16, %v1722_v60 }
  0xef   : > { %v623_v17 = vpack.c.bf16 %v593_v14, %v592_v12  ;;  %v591_v18 = vsel %vm527_vm5, %v403_v6, %v559_v9  ;;  %v1439_v19 = vpop.f32.mrb[4].mxu0  ;;  %vm542_vm8 = vcmp.ge.f32.partialorder %v464_v15, 0.0  ;;  %v574_v25 = vmul.f32 0.2, %v464_v15 }
  0xf0   : > { %v622_v22 = vpack.c.bf16 %v591_v18, %v590_v13  ;;  %v424_v23 = vadd.f32 %v1439_v19, %v1722_v60  ;;  %v415_v24 = vpop.f32.mrb[5].mxu0  ;;  %v1732_v28 = vsel %vm544_vm7, %v472_v10, %v576_v20  ;;  %v467_v30 = vadd.f32 %v1722_v60, %v466_v21 }
  0xf1   : > { %v416_v26 = vadd.f32 %v1722_v60, %v415_v24  ;;  %v1440_v27 = vpop.f32.mrb[6].mxu0  ;;  %v1738_v34 = vsel %vm542_vm8, %v464_v15, %v574_v25  ;;  %vm545_vm11 = vcmp.ge.f32.partialorder %v475_v29, 0.0  ;;  %v577_v39 = vmul.f32 0.2, %v475_v29 }
  0xf2   : > { %vm532_vm9 = vcmp.ge.f32.partialorder %v424_v23, 0.0  ;;  %v564_v31 = vmul.f32 0.2, %v424_v23  ;;  %v427_v32 = vadd.f32 %v1440_v27, %v1722_v60  ;;  %v418_v33 = vpop.f32.mrb[7].mxu0  ;;  %1473 = vmatprep.mubr.msk.bf16.mxu1 %vm677_vm6, %v622_v22  ;;  %vm543_vm14 = vcmp.ge.f32.partialorder %v467_v30, 0.0 }
  0xf3   : > { %vm530_vm10 = vcmp.ge.f32.partialorder %v416_v26, 0.0  ;;  %v562_v35 = vmul.f32 0.2, %v416_v26  ;;  %v419_v36 = vadd.f32 %v1722_v60, %v418_v33  ;;  %1474 = vmatmul.mubr.msk.bf16.vlgmr.msra.gmra.mrb[16].mxu1 %vm677_vm6, %v623_v17  ;;  %v1455_v40 = vpop.f32.mrb[4].mxu1  ;;  %v1742_v45 = vsel %vm545_vm11, %v475_v29, %v577_v39 }
  0xf4   : > { %v596_v37 = vsel %vm532_vm9, %v424_v23, %v564_v31  ;;  %vm533_vm12 = vcmp.ge.f32.partialorder %v427_v32, 0.0  ;;  %v565_v38 = vmul.f32 0.2, %v427_v32  ;;  %v479_v43 = vpop.f32.mrb[5].mxu1  ;;  %v575_v46 = vmul.f32 0.2, %v467_v30 }
  0xf5   : > { %v594_v41 = vsel %vm530_vm10, %v416_v26, %v562_v35  ;;  %vm531_vm13 = vcmp.ge.f32.partialorder %v419_v36, 0.0  ;;  %v563_v42 = vmul.f32 0.2, %v419_v36  ;;  %v488_v47 = vadd.f32 %v1455_v40, %v1722_v60  ;;  %v1456_v48 = vpop.f32.mrb[6].mxu1 }
  0xf6   : > { %v597_v44 = vsel %vm533_vm12, %v427_v32, %v565_v38  ;;  %v631_v52 = vpack.c.bf16 %v1742_v45, %v1732_v28  ;;  %v480_v53 = vadd.f32 %v1722_v60, %v479_v43  ;;  %v482_v54 = vpop.f32.mrb[7].mxu1  ;;  %v1750_v58 = vsel %vm543_vm14, %v467_v30, %v575_v46  ;;  %v1576_v28 = vld [vmem:[%s1925_s5 + $0x38] sm:$0xff]   ;;  %v1812_v45 = vld [vmem:[%s1924_s4] ss:$0 sm:$0xff] }
  0xf7   : > { %v625_v49 = vpack.c.bf16 %v597_v44, %v596_v37  ;;  %v595_v50 = vsel %vm531_vm13, %v419_v36, %v563_v42  ;;  %v1443_v51 = vpop.f32.mrb[8].mxu0  ;;  %vm548_vm15 = vcmp.ge.f32.partialorder %v488_v47, 0.0  ;;  %v630_v62 = vpack.c.bf16 %v1750_v58, %v1738_v34  ;;  %v1575_v34 = vld [vmem:[%s1925_s5 + $0x30] sm:$0xff]  }
  0xf8   : > { %v624_v55 = vpack.c.bf16 %v595_v50, %v594_v41  ;;  %v440_v56 = vadd.f32 %v1443_v51, %v1722_v60  ;;  %v431_v57 = vpop.f32.mrb[9].mxu0  ;;  %v580_v63 = vmul.f32 0.2, %v488_v47  ;;  %vm546_vm0 = vcmp.ge.f32.partialorder %v480_v53, 0.0  ;;  %1517 = vmatprep.subr.bf16.mxu0 %v1575_v34 }
  0xf9   : > { %v432_v59 = vadd.f32 %v1722_v60, %v431_v57  ;;  %v1444_v61 = vpop.f32.mrb[10].mxu0  ;;  %v578_v3 = vmul.f32 0.2, %v480_v53  ;;  %v491_v13 = vadd.f32 %v1456_v48, %v1722_v60  ;;  %v483_v16 = vadd.f32 %v1722_v60, %v482_v54  ;;  %1518 = vmatpush3.bf16.msra.mxu0 %v1575_v34 }
  0xfa   : > { %vm536_vm1 = vcmp.ge.f32.partialorder %v440_v56, 0.0  ;;  %v568_v0 = vmul.f32 0.2, %v440_v56  ;;  %v443_v1 = vadd.f32 %v1444_v61, %v1722_v60  ;;  %v434_v2 = vpop.f32.mrb[11].mxu0  ;;  %1477 = vmatprep.mubr.msk.bf16.mxu1 %vm677_vm6, %v624_v55  ;;  %v1760_v6 = vsel %vm548_vm15, %v488_v47, %v580_v63  ;;  %1519 = vmatprep.subr.bf16.mxu0 %v1576_v28 }
  0xfb   : > { %vm534_vm2 = vcmp.ge.f32.partialorder %v432_v59, 0.0  ;;  %v566_v4 = vmul.f32 0.2, %v432_v59  ;;  %v435_v5 = vadd.f32 %v1722_v60, %v434_v2  ;;  %1478 = vmatmul.mubr.msk.bf16.gmra.mrb[20].mxu1 %vm677_vm6, %v625_v49  ;;  %v1762_v9 = vsel %vm546_vm0, %v480_v53, %v578_v3  ;;  %v1459_v10 = vpop.f32.mrb[8].mxu1 }
  0xfc   : > { %v600_v7 = vsel %vm536_vm1, %v440_v56, %v568_v0  ;;  %vm537_vm3 = vcmp.ge.f32.partialorder %v443_v1, 0.0  ;;  %v569_v8 = vmul.f32 0.2, %v443_v1  ;;  %v495_v14 = vpop.f32.mrb[9].mxu1  ;;  %v504_v17 = vadd.f32 %v1459_v10, %v1722_v60 }
  0xfd   : > { %v598_v11 = vsel %vm534_vm2, %v432_v59, %v566_v4  ;;  %vm535_vm4 = vcmp.ge.f32.partialorder %v435_v5, 0.0  ;;  %v567_v12 = vmul.f32 0.2, %v435_v5  ;;  %v496_v18 = vadd.f32 %v1722_v60, %v495_v14  ;;  %v1460_v19 = vpop.f32.mrb[10].mxu1  ;;  %1520 = vmatpush3.bf16.msra.mxu0 %v1576_v28 }
  0xfe   : > { %v601_v15 = vsel %vm537_vm3, %v443_v1, %v569_v8  ;;  %vm549_vm5 = vcmp.ge.f32.partialorder %v491_v13, 0.0  ;;  %v581_v23 = vmul.f32 0.2, %v491_v13  ;;  %v498_v24 = vpop.f32.mrb[11].mxu1  ;;  %vm547_vm7 = vcmp.ge.f32.partialorder %v483_v16, 0.0 }
  0xff   : > { %v627_v20 = vpack.c.bf16 %v601_v15, %v600_v7  ;;  %v599_v21 = vsel %vm535_vm4, %v435_v5, %v567_v12  ;;  %v1447_v22 = vpop.f32.mrb[12].mxu0  ;;  %v579_v29 = vmul.f32 0.2, %v483_v16  ;;  %vm552_vm8 = vcmp.ge.f32.partialorder %v504_v17, 0.0 }
 0x100   : > { %v626_v25 = vpack.c.bf16 %v599_v21, %v598_v11  ;;  %v456_v26 = vadd.f32 %v1447_v22, %v1722_v60  ;;  %v447_v27 = vpop.f32.mrb[13].mxu0  ;;  %v1770_v32 = vsel %vm549_vm5, %v491_v13, %v581_v23  ;;  %v584_v33 = vmul.f32 0.2, %v504_v17 }
 0x101   : > { %v448_v30 = vadd.f32 %v1722_v60, %v447_v27  ;;  %v1448_v31 = vpop.f32.mrb[14].mxu0  ;;  %v633_v38 = vpack.c.bf16 %v1770_v32, %v1760_v6  ;;  %v611_v41 = vsel %vm547_vm7, %v483_v16, %v579_v29  ;;  %vm550_vm13 = vcmp.ge.f32.partialorder %v496_v18, 0.0 }
 0x102   : > { %vm540_vm9 = vcmp.ge.f32.partialorder %v456_v26, 0.0  ;;  %v572_v35 = vmul.f32 0.2, %v456_v26  ;;  %v459_v36 = vadd.f32 %v1448_v31, %v1722_v60  ;;  %v450_v37 = vpop.f32.mrb[15].mxu0  ;;  %1481 = vmatprep.mubr.msk.bf16.mxu1 %vm677_vm6, %v626_v25  ;;  %v632_v44 = vpack.c.bf16 %v611_v41, %v1762_v9 }
 0x103   : > { %vm538_vm10 = vcmp.ge.f32.partialorder %v448_v30, 0.0  ;;  %v570_v39 = vmul.f32 0.2, %v448_v30  ;;  %v451_v40 = vadd.f32 %v1722_v60, %v450_v37  ;;  %1482 = vmatmul.mubr.msk.bf16.gmra.mrb[24].mxu1 %vm677_vm6, %v627_v20  ;;  %v1463_v46 = vpop.f32.mrb[12].mxu1  ;;  %v616_v49 = vsel %vm552_vm8, %v504_v17, %v584_v33 }
 0x104   : > { %v604_v42 = vsel %vm540_vm9, %v456_v26, %v572_v35  ;;  %vm541_vm11 = vcmp.ge.f32.partialorder %v459_v36, 0.0  ;;  %v573_v43 = vmul.f32 0.2, %v459_v36  ;;  %v511_v50 = vpop.f32.mrb[13].mxu1  ;;  %v582_v53 = vmul.f32 0.2, %v496_v18 }
 0x105   : > { %v602_v47 = vsel %vm538_vm10, %v448_v30, %v570_v39  ;;  %vm539_vm12 = vcmp.ge.f32.partialorder %v451_v40, 0.0  ;;  %v571_v48 = vmul.f32 0.2, %v451_v40  ;;  %v507_v54 = vadd.f32 %v1460_v19, %v1722_v60  ;;  %v1464_v55 = vpop.f32.mrb[14].mxu1 }
 0x106   : > { %v605_v51 = vsel %vm541_vm11, %v459_v36, %v573_v43  ;;  %v499_v59 = vadd.f32 %v1722_v60, %v498_v24  ;;  %v520_v61 = vadd.f32 %v1463_v46, %v1722_v60  ;;  %v514_v63 = vpop.f32.mrb[15].mxu1  ;;  %v614_v1 = vsel %vm550_vm13, %v496_v18, %v582_v53 }
 0x107   : > { %v629_v56 = vpack.c.bf16 %v605_v51, %v604_v42  ;;  %v603_v57 = vsel %vm539_vm12, %v451_v40, %v571_v48  ;;  %vm553_vm14 = vcmp.ge.f32.partialorder %v507_v54, 0.0  ;;  %v585_v2 = vmul.f32 0.2, %v507_v54 }
 0x108   : > { %v628_v0 = vpack.c.bf16 %v603_v57, %v602_v47  ;;  %vm551_vm15 = vcmp.ge.f32.partialorder %v499_v59, 0.0  ;;  %v583_v3 = vmul.f32 0.2, %v499_v59  ;;  %vm556_vm0 = vcmp.ge.f32.partialorder %v520_v61, 0.0 }
 0x109   : > { %v588_v4 = vmul.f32 0.2, %v520_v61  ;;  %v617_v5 = vsel %vm553_vm14, %v507_v54, %v585_v2  ;;  %v512_v6 = vadd.f32 %v1722_v60, %v511_v50  ;;  %v523_v7 = vadd.f32 %v1464_v55, %v1722_v60 }
 0x10a   : > { %1485 = vmatprep.mubr.msk.bf16.mxu1 %vm677_vm6, %v628_v0  ;;  %v515_v8 = vadd.f32 %v1722_v60, %v514_v63  ;;  %v635_v9 = vpack.c.bf16 %v617_v5, %v616_v49  ;;  %v615_v10 = vsel %vm551_vm15, %v499_v59, %v583_v3 }
 0x10b   : > { %1486 = vmatmul.mubr.msk.bf16.gmra.mrb[28].mxu1 %vm677_vm6, %v629_v56  ;;  %v634_v11 = vpack.c.bf16 %v615_v10, %v614_v1  ;;  %vm554_vm1 = vcmp.ge.f32.partialorder %v512_v6, 0.0  ;;  %v586_v12 = vmul.f32 0.2, %v512_v6  ;;  %vm557_vm2 = vcmp.ge.f32.partialorder %v523_v7, 0.0 }
 0x10c   : > { %1489 = vmatprep.mubr.msk.bf16.mxu1 %vm677_vm6, %v630_v62  ;;  %v620_v13 = vsel %vm556_vm0, %v520_v61, %v588_v4  ;;  %v589_v14 = vmul.f32 0.2, %v523_v7  ;;  %vm555_vm3 = vcmp.ge.f32.partialorder %v515_v8, 0.0  ;;  %v587_v15 = vmul.f32 0.2, %v515_v8 }
 0x10d   : > { %v618_v16 = vsel %vm554_vm1, %v512_v6, %v586_v12 }
 0x10e   : > { %v621_v17 = vsel %vm557_vm2, %v523_v7, %v589_v14  ;;  %v619_v60 = vsel %vm555_vm3, %v515_v8, %v587_v15 }
 0x10f   : > { %v637_v18 = vpack.c.bf16 %v621_v17, %v620_v13  ;;  %v636_v19 = vpack.c.bf16 %v619_v60, %v618_v16 }
 0x113   : > { %1490 = vmatmul.mubr.msk.bf16.gmra.mrb[32].mxu1 %vm677_vm6, %v631_v52 }
 0x114   : > { %1493 = vmatprep.mubr.msk.bf16.mxu1 %vm677_vm6, %v632_v44 }
 0x11b   : > { %1494 = vmatmul.mubr.msk.bf16.gmra.mrb[36].mxu1 %vm677_vm6, %v633_v38 }
 0x11c   : > { %1497 = vmatprep.mubr.msk.bf16.mxu1 %vm677_vm6, %v634_v11 }
 0x123   : > { %1498 = vmatmul.mubr.msk.bf16.gmra.mrb[40].mxu1 %vm677_vm6, %v635_v9 }
 0x124   : > { %1501 = vmatprep.mubr.msk.bf16.mxu1 %vm677_vm6, %v636_v19 }
 0x12b   : > { %1502 = vmatmul.mubr.msk.bf16.gmra.mrb[44].mxu1 %vm677_vm6, %v637_v18 }
 0x1c6   : > { %v1475_v52 = vpop.f32.mrb[16].mxu1 }
 0x1c7   : > { %v769_v58 = vadd.f32 %v1475_v52, %v1812_v45  ;;  %v760_v62 = vpop.f32.mrb[17].mxu1 }
 0x1c8   : > { %v761_v20 = vadd.f32 %v1812_v45, %v760_v62  ;;  %v1476_v21 = vpop.f32.mrb[18].mxu1 }
 0x1c9   : > { %v921_v22 = vmul.f32 0.2, %v769_v58  ;;  %v772_v23 = vadd.f32 %v1476_v21, %v1812_v45  ;;  %v763_v24 = vpop.f32.mrb[19].mxu1  ;;  %vm889_vm6 = vcmp.ge.f32.partialorder %v769_v58, 0.0 }
 0x1ca   : > { %v919_v25 = vmul.f32 0.2, %v761_v20  ;;  %v764_v26 = vadd.f32 %v1812_v45, %v763_v24  ;;  %vm887_vm4 = vcmp.ge.f32.partialorder %v761_v20, 0.0 }
 0x1cb   : > { %vm890_vm5 = vcmp.ge.f32.partialorder %v772_v23, 0.0  ;;  %v922_v27 = vmul.f32 0.2, %v772_v23  ;;  %v953_v30 = vsel %vm889_vm6, %v769_v58, %v921_v22 }
 0x1cc   : > { %vm888_vm7 = vcmp.ge.f32.partialorder %v764_v26, 0.0  ;;  %v920_v29 = vmul.f32 0.2, %v764_v26  ;;  %v951_v35 = vsel %vm887_vm4, %v761_v20, %v919_v25 }
 0x1cd   : > { %v954_v31 = vsel %vm890_vm5, %v772_v23, %v922_v27 }
 0x1ce   : > { %v984_v32 = vpack.c.bf16 %v954_v31, %v953_v30  ;;  %v1479_v33 = vpop.f32.mrb[20].mxu1  ;;  %v952_v36 = vsel %vm888_vm7, %v764_v26, %v920_v29 }
 0x1cf   : > { %v785_v37 = vadd.f32 %v1479_v33, %v1812_v45  ;;  %v776_v38 = vpop.f32.mrb[21].mxu1  ;;  %v983_v39 = vpack.c.bf16 %v952_v36, %v951_v35 }
 0x1d0   : > { %v777_v40 = vadd.f32 %v1812_v45, %v776_v38  ;;  %v1480_v41 = vpop.f32.mrb[22].mxu1 }
 0x1d1   : > { %v925_v42 = vmul.f32 0.2, %v785_v37  ;;  %v788_v43 = vadd.f32 %v1480_v41, %v1812_v45  ;;  %v779_v44 = vpop.f32.mrb[23].mxu1  ;;  %1521 = vmatprep.mubr.bf16.mxu0 %v983_v39  ;;  %vm893_vm8 = vcmp.ge.f32.partialorder %v785_v37, 0.0 }
 0x1d2   : > { %v923_v46 = vmul.f32 0.2, %v777_v40  ;;  %v780_v47 = vadd.f32 %v1812_v45, %v779_v44  ;;  %1522 = vmatmul.mubr.bf16.vlgmr.msra.gmra.mrb[16].mxu0 %v984_v32  ;;  %vm891_vm9 = vcmp.ge.f32.partialorder %v777_v40, 0.0 }
 0x1d3   : > { %vm894_vm10 = vcmp.ge.f32.partialorder %v788_v43, 0.0  ;;  %v926_v48 = vmul.f32 0.2, %v788_v43  ;;  %v957_v50 = vsel %vm893_vm8, %v785_v37, %v925_v42 }
 0x1d4   : > { %vm892_vm11 = vcmp.ge.f32.partialorder %v780_v47, 0.0  ;;  %v924_v49 = vmul.f32 0.2, %v780_v47  ;;  %v955_v54 = vsel %vm891_vm9, %v777_v40, %v923_v46 }
 0x1d5   : > { %v958_v51 = vsel %vm894_vm10, %v788_v43, %v926_v48 }
 0x1d6   : > { %v1483_v53 = vpop.f32.mrb[24].mxu1  ;;  %v956_v55 = vsel %vm892_vm11, %v780_v47, %v924_v49  ;;  %v986_v56 = vpack.c.bf16 %v958_v51, %v957_v50 }
 0x1d7   : > { %v801_v57 = vadd.f32 %v1483_v53, %v1812_v45  ;;  %v792_v59 = vpop.f32.mrb[25].mxu1  ;;  %v985_v61 = vpack.c.bf16 %v956_v55, %v955_v54 }
 0x1d8   : > { %v793_v63 = vadd.f32 %v1812_v45, %v792_v59  ;;  %v1484_v0 = vpop.f32.mrb[26].mxu1 }
 0x1d9   : > { %v929_v1 = vmul.f32 0.2, %v801_v57  ;;  %v804_v2 = vadd.f32 %v1484_v0, %v1812_v45  ;;  %v795_v3 = vpop.f32.mrb[27].mxu1  ;;  %1525 = vmatprep.mubr.bf16.mxu0 %v985_v61  ;;  %vm897_vm12 = vcmp.ge.f32.partialorder %v801_v57, 0.0 }
 0x1da   : > { %v927_v4 = vmul.f32 0.2, %v793_v63  ;;  %v796_v5 = vadd.f32 %v1812_v45, %v795_v3  ;;  %1526 = vmatmul.mubr.bf16.gmra.mrb[20].mxu0 %v986_v56  ;;  %vm895_vm13 = vcmp.ge.f32.partialorder %v793_v63, 0.0 }
 0x1db   : > { %vm898_vm14 = vcmp.ge.f32.partialorder %v804_v2, 0.0  ;;  %v930_v6 = vmul.f32 0.2, %v804_v2  ;;  %v961_v8 = vsel %vm897_vm12, %v801_v57, %v929_v1 }
 0x1dc   : > { %vm896_vm15 = vcmp.ge.f32.partialorder %v796_v5, 0.0  ;;  %v928_v7 = vmul.f32 0.2, %v796_v5  ;;  %v959_v11 = vsel %vm895_vm13, %v793_v63, %v927_v4 }
 0x1dd   : > { %v962_v9 = vsel %vm898_vm14, %v804_v2, %v930_v6 }
 0x1de   : > { %v1487_v10 = vpop.f32.mrb[28].mxu1  ;;  %v960_v12 = vsel %vm896_vm15, %v796_v5, %v928_v7  ;;  %v988_v13 = vpack.c.bf16 %v962_v9, %v961_v8 }
 0x1df   : > { %v817_v14 = vadd.f32 %v1487_v10, %v1812_v45  ;;  %v808_v15 = vpop.f32.mrb[29].mxu1  ;;  %v987_v16 = vpack.c.bf16 %v960_v12, %v959_v11 }
 0x1e0   : > { %v809_v17 = vadd.f32 %v1812_v45, %v808_v15  ;;  %v1488_v60 = vpop.f32.mrb[30].mxu1 }
 0x1e1   : > { %v933_v18 = vmul.f32 0.2, %v817_v14  ;;  %v820_v19 = vadd.f32 %v1488_v60, %v1812_v45  ;;  %v811_v34 = vpop.f32.mrb[31].mxu1  ;;  %1529 = vmatprep.mubr.bf16.mxu0 %v987_v16  ;;  %vm901_vm0 = vcmp.ge.f32.partialorder %v817_v14, 0.0 }
 0x1e2   : > { %v931_v28 = vmul.f32 0.2, %v809_v17  ;;  %v812_v52 = vadd.f32 %v1812_v45, %v811_v34  ;;  %1530 = vmatmul.mubr.bf16.gmra.mrb[24].mxu0 %v988_v13  ;;  %vm899_vm1 = vcmp.ge.f32.partialorder %v809_v17, 0.0 }
 0x1e3   : > { %vm902_vm2 = vcmp.ge.f32.partialorder %v820_v19, 0.0  ;;  %v934_v58 = vmul.f32 0.2, %v820_v19  ;;  %v965_v20 = vsel %vm901_vm0, %v817_v14, %v933_v18 }
 0x1e4   : > { %vm900_vm3 = vcmp.ge.f32.partialorder %v812_v52, 0.0  ;;  %v932_v62 = vmul.f32 0.2, %v812_v52  ;;  %v963_v23 = vsel %vm899_vm1, %v809_v17, %v931_v28 }
 0x1e5   : > { %v966_v21 = vsel %vm902_vm2, %v820_v19, %v934_v58 }
 0x1e6   : > { %v1491_v22 = vpop.f32.mrb[32].mxu1  ;;  %v964_v24 = vsel %vm900_vm3, %v812_v52, %v932_v62  ;;  %v990_v25 = vpack.c.bf16 %v966_v21, %v965_v20 }
 0x1e7   : > { %v833_v26 = vadd.f32 %v1491_v22, %v1812_v45  ;;  %v824_v27 = vpop.f32.mrb[33].mxu1  ;;  %v989_v29 = vpack.c.bf16 %v964_v24, %v963_v23 }
 0x1e8   : > { %v825_v30 = vadd.f32 %v1812_v45, %v824_v27  ;;  %v1492_v31 = vpop.f32.mrb[34].mxu1 }
 0x1e9   : > { %v937_v32 = vmul.f32 0.2, %v833_v26  ;;  %v836_v33 = vadd.f32 %v1492_v31, %v1812_v45  ;;  %v827_v35 = vpop.f32.mrb[35].mxu1  ;;  %1533 = vmatprep.mubr.bf16.mxu0 %v989_v29  ;;  %vm905_vm6 = vcmp.ge.f32.partialorder %v833_v26, 0.0 }
 0x1ea   : > { %v935_v36 = vmul.f32 0.2, %v825_v30  ;;  %v828_v37 = vadd.f32 %v1812_v45, %v827_v35  ;;  %1534 = vmatmul.mubr.bf16.gmra.mrb[28].mxu0 %v990_v25  ;;  %vm903_vm4 = vcmp.ge.f32.partialorder %v825_v30, 0.0 }
 0x1eb   : > { %vm906_vm5 = vcmp.ge.f32.partialorder %v836_v33, 0.0  ;;  %v938_v38 = vmul.f32 0.2, %v836_v33  ;;  %v969_v40 = vsel %vm905_vm6, %v833_v26, %v937_v32  ;;  %vm1224_vm6 = vcmask 15360  }
 0x1ec   : > { %vm904_vm7 = vcmp.ge.f32.partialorder %v828_v37, 0.0  ;;  %v936_v39 = vmul.f32 0.2, %v828_v37  ;;  %v967_v43 = vsel %vm903_vm4, %v825_v30, %v935_v36 }
 0x1ed   : > { %v970_v41 = vsel %vm906_vm5, %v836_v33, %v938_v38 }
 0x1ee   : > { %v1495_v42 = vpop.f32.mrb[36].mxu1  ;;  %v968_v44 = vsel %vm904_vm7, %v828_v37, %v936_v39  ;;  %v992_v46 = vpack.c.bf16 %v970_v41, %v969_v40 }
 0x1ef   : > { %v849_v47 = vadd.f32 %v1495_v42, %v1812_v45  ;;  %v840_v48 = vpop.f32.mrb[37].mxu1  ;;  %v991_v49 = vpack.c.bf16 %v968_v44, %v967_v43 }
 0x1f0   : > { %v841_v50 = vadd.f32 %v1812_v45, %v840_v48  ;;  %v1496_v51 = vpop.f32.mrb[38].mxu1 }
 0x1f1   : > { %v941_v53 = vmul.f32 0.2, %v849_v47  ;;  %v852_v54 = vadd.f32 %v1496_v51, %v1812_v45  ;;  %v843_v55 = vpop.f32.mrb[39].mxu1  ;;  %1537 = vmatprep.mubr.bf16.mxu0 %v991_v49  ;;  %vm909_vm8 = vcmp.ge.f32.partialorder %v849_v47, 0.0 }
 0x1f2   : > { %v939_v56 = vmul.f32 0.2, %v841_v50  ;;  %v844_v57 = vadd.f32 %v1812_v45, %v843_v55  ;;  %1538 = vmatmul.mubr.bf16.gmra.mrb[32].mxu0 %v992_v46  ;;  %vm907_vm9 = vcmp.ge.f32.partialorder %v841_v50, 0.0 }
 0x1f3   : > { %vm910_vm10 = vcmp.ge.f32.partialorder %v852_v54, 0.0  ;;  %v942_v59 = vmul.f32 0.2, %v852_v54  ;;  %v973_v63 = vsel %vm909_vm8, %v849_v47, %v941_v53 }
 0x1f4   : > { %vm908_vm11 = vcmp.ge.f32.partialorder %v844_v57, 0.0  ;;  %v940_v61 = vmul.f32 0.2, %v844_v57  ;;  %v971_v2 = vsel %vm907_vm9, %v841_v50, %v939_v56 }
 0x1f5   : > { %v974_v0 = vsel %vm910_vm10, %v852_v54, %v942_v59 }
 0x1f6   : > { %v1499_v1 = vpop.f32.mrb[40].mxu1  ;;  %v972_v3 = vsel %vm908_vm11, %v844_v57, %v940_v61  ;;  %v994_v4 = vpack.c.bf16 %v974_v0, %v973_v63 }
 0x1f7   : > { %v865_v5 = vadd.f32 %v1499_v1, %v1812_v45  ;;  %v856_v6 = vpop.f32.mrb[41].mxu1  ;;  %v993_v7 = vpack.c.bf16 %v972_v3, %v971_v2 }
 0x1f8   : > { %v857_v8 = vadd.f32 %v1812_v45, %v856_v6  ;;  %v1500_v9 = vpop.f32.mrb[42].mxu1 }
 0x1f9   : > { %v945_v10 = vmul.f32 0.2, %v865_v5  ;;  %v868_v11 = vadd.f32 %v1500_v9, %v1812_v45  ;;  %v859_v12 = vpop.f32.mrb[43].mxu1  ;;  %1541 = vmatprep.mubr.bf16.mxu0 %v993_v7  ;;  %vm913_vm12 = vcmp.ge.f32.partialorder %v865_v5, 0.0 }
 0x1fa   : > { %v943_v13 = vmul.f32 0.2, %v857_v8  ;;  %v860_v14 = vadd.f32 %v1812_v45, %v859_v12  ;;  %1542 = vmatmul.mubr.bf16.gmra.mrb[36].mxu0 %v994_v4  ;;  %vm911_vm13 = vcmp.ge.f32.partialorder %v857_v8, 0.0 }
 0x1fb   : > { %vm914_vm14 = vcmp.ge.f32.partialorder %v868_v11, 0.0  ;;  %v946_v15 = vmul.f32 0.2, %v868_v11  ;;  %v977_v17 = vsel %vm913_vm12, %v865_v5, %v945_v10 }
 0x1fc   : > { %vm912_vm15 = vcmp.ge.f32.partialorder %v860_v14, 0.0  ;;  %v944_v16 = vmul.f32 0.2, %v860_v14  ;;  %v975_v19 = vsel %vm911_vm13, %v857_v8, %v943_v13 }
 0x1fd   : > { %v978_v60 = vsel %vm914_vm14, %v868_v11, %v946_v15 }
 0x1fe   : > { %v1503_v18 = vpop.f32.mrb[44].mxu1  ;;  %v976_v34 = vsel %vm912_vm15, %v860_v14, %v944_v16  ;;  %v996_v28 = vpack.c.bf16 %v978_v60, %v977_v17 }
 0x1ff   : > { %v881_v52 = vadd.f32 %v1503_v18, %v1812_v45  ;;  %v872_v58 = vpop.f32.mrb[45].mxu1  ;;  %v995_v62 = vpack.c.bf16 %v976_v34, %v975_v19 }
 0x200   : > { %v873_v20 = vadd.f32 %v1812_v45, %v872_v58  ;;  %v1504_v21 = vpop.f32.mrb[46].mxu1 }
 0x201   : > { %v949_v22 = vmul.f32 0.2, %v881_v52  ;;  %v884_v23 = vadd.f32 %v1504_v21, %v1812_v45  ;;  %v875_v24 = vpop.f32.mrb[47].mxu1  ;;  %1545 = vmatprep.mubr.bf16.mxu0 %v995_v62  ;;  %vm917_vm0 = vcmp.ge.f32.partialorder %v881_v52, 0.0 }
 0x202   : > { %v947_v25 = vmul.f32 0.2, %v873_v20  ;;  %v876_v26 = vadd.f32 %v1812_v45, %v875_v24  ;;  %1546 = vmatmul.mubr.bf16.gmra.mrb[40].mxu0 %v996_v28  ;;  %vm915_vm1 = vcmp.ge.f32.partialorder %v873_v20, 0.0 }
 0x203   : > { %vm918_vm2 = vcmp.ge.f32.partialorder %v884_v23, 0.0  ;;  %v950_v27 = vmul.f32 0.2, %v884_v23  ;;  %v981_v30 = vsel %vm917_vm0, %v881_v52, %v949_v22 }
 0x204   : > { %vm916_vm3 = vcmp.ge.f32.partialorder %v876_v26, 0.0  ;;  %v948_v29 = vmul.f32 0.2, %v876_v26  ;;  %v979_v32 = vsel %vm915_vm1, %v873_v20, %v947_v25 }
 0x205   : > { %v982_v31 = vsel %vm918_vm2, %v884_v23, %v950_v27 }
 0x206   : > { %v980_v33 = vsel %vm916_vm3, %v876_v26, %v948_v29  ;;  %v998_v35 = vpack.c.bf16 %v982_v31, %v981_v30 }
 0x207   : > { %v997_v36 = vpack.c.bf16 %v980_v33, %v979_v32 }
 0x209   : > { %1549 = vmatprep.mubr.bf16.mxu0 %v997_v36 }
 0x20a   : > { %1550 = vmatmul.mubr.bf16.gmra.mrb[44].mxu0 %v998_v35 }
 0x2a5   : > { %v1523_v45 = vpop.f32.mrb[16].mxu0 }
 0x2a6   : > { %1227 = vst.msk [vmem:[%s1851_s15 + $0x10] sm:$0xff] %vm1224_vm6, %v1523_v45  ;;  %v1097_v37 = vpop.f32.mrb[17].mxu0 }
 0x2a7   : > { %1225 = vst.msk [vmem:[%s1851_s15] sm:$0xff] %vm1224_vm6, %v1097_v37  ;;  %v1524_v38 = vpop.f32.mrb[18].mxu0 }
 0x2a8   : > { %1228 = vst.msk [vmem:[%s1851_s15 + $0x18] sm:$0xff] %vm1224_vm6, %v1524_v38  ;;  %v1100_v39 = vpop.f32.mrb[19].mxu0 }
 0x2a9   : > { %1226 = vst.msk [vmem:[%s1851_s15 + $0x8] sm:$0xff] %vm1224_vm6, %v1100_v39 }
 0x2ad   : > { %v1527_v40 = vpop.f32.mrb[20].mxu0 }
 0x2ae   : > { %1231 = vst.msk [vmem:[%s1851_s15 + $0x30] sm:$0xff] %vm1224_vm6, %v1527_v40  ;;  %v1113_v41 = vpop.f32.mrb[21].mxu0 }
 0x2af   : > { %1229 = vst.msk [vmem:[%s1851_s15 + $0x20] sm:$0xff] %vm1224_vm6, %v1113_v41  ;;  %v1528_v42 = vpop.f32.mrb[22].mxu0 }
 0x2b0   : > { %1232 = vst.msk [vmem:[%s1851_s15 + $0x38] sm:$0xff] %vm1224_vm6, %v1528_v42  ;;  %v1116_v43 = vpop.f32.mrb[23].mxu0 }
 0x2b1   : > { %1230 = vst.msk [vmem:[%s1851_s15 + $0x28] sm:$0xff] %vm1224_vm6, %v1116_v43 }
 0x2b5   : > { %v1531_v44 = vpop.f32.mrb[24].mxu0 }
 0x2b6   : > { %1235 = vst.msk [vmem:[%s1851_s15 + $0x50] sm:$0xff] %vm1224_vm6, %v1531_v44  ;;  %v1129_v46 = vpop.f32.mrb[25].mxu0 }
 0x2b7   : > { %1233 = vst.msk [vmem:[%s1851_s15 + $0x40] sm:$0xff] %vm1224_vm6, %v1129_v46  ;;  %v1532_v47 = vpop.f32.mrb[26].mxu0 }
 0x2b8   : > { %1236 = vst.msk [vmem:[%s1851_s15 + $0x58] sm:$0xff] %vm1224_vm6, %v1532_v47  ;;  %v1132_v48 = vpop.f32.mrb[27].mxu0 }
 0x2b9   : > { %1234 = vst.msk [vmem:[%s1851_s15 + $0x48] sm:$0xff] %vm1224_vm6, %v1132_v48 }
 0x2bd   : > { %v1535_v49 = vpop.f32.mrb[28].mxu0 }
 0x2be   : > { %1239 = vst.msk [vmem:[%s1851_s15 + $0x70] sm:$0xff] %vm1224_vm6, %v1535_v49  ;;  %v1145_v50 = vpop.f32.mrb[29].mxu0 }
 0x2bf   : > { %1237 = vst.msk [vmem:[%s1851_s15 + $0x60] sm:$0xff] %vm1224_vm6, %v1145_v50  ;;  %v1536_v51 = vpop.f32.mrb[30].mxu0 }
 0x2c0   : > { %1240 = vst.msk [vmem:[%s1851_s15 + $0x78] sm:$0xff] %vm1224_vm6, %v1536_v51  ;;  %v1148_v53 = vpop.f32.mrb[31].mxu0 }
 0x2c1   : > { %1238 = vst.msk [vmem:[%s1851_s15 + $0x68] sm:$0xff] %vm1224_vm6, %v1148_v53 }
 0x2c5   : > { %v1539_v54 = vpop.f32.mrb[32].mxu0 }
 0x2c6   : > { %1243 = vst.msk [vmem:[%s1851_s15 + $0x90] sm:$0xff] %vm1224_vm6, %v1539_v54  ;;  %v1161_v55 = vpop.f32.mrb[33].mxu0 }
 0x2c7   : > { %1241 = vst.msk [vmem:[%s1851_s15 + $0x80] sm:$0xff] %vm1224_vm6, %v1161_v55  ;;  %v1540_v56 = vpop.f32.mrb[34].mxu0 }
 0x2c8   : > { %1244 = vst.msk [vmem:[%s1851_s15 + $0x98] sm:$0xff] %vm1224_vm6, %v1540_v56  ;;  %v1164_v57 = vpop.f32.mrb[35].mxu0 }
 0x2c9   : > { %1242 = vst.msk [vmem:[%s1851_s15 + $0x88] sm:$0xff] %vm1224_vm6, %v1164_v57 }
 0x2cd   : > { %v1543_v59 = vpop.f32.mrb[36].mxu0 }
 0x2ce   : > { %1247 = vst.msk [vmem:[%s1851_s15 + $0xb0] sm:$0xff] %vm1224_vm6, %v1543_v59  ;;  %v1177_v61 = vpop.f32.mrb[37].mxu0 }
 0x2cf   : > { %1245 = vst.msk [vmem:[%s1851_s15 + $0xa0] sm:$0xff] %vm1224_vm6, %v1177_v61  ;;  %v1544_v63 = vpop.f32.mrb[38].mxu0 }
 0x2d0   : > { %1248 = vst.msk [vmem:[%s1851_s15 + $0xb8] sm:$0xff] %vm1224_vm6, %v1544_v63  ;;  %v1180_v0 = vpop.f32.mrb[39].mxu0 }
 0x2d1   : > { %1246 = vst.msk [vmem:[%s1851_s15 + $0xa8] sm:$0xff] %vm1224_vm6, %v1180_v0 }
 0x2d5   : > { %v1547_v1 = vpop.f32.mrb[40].mxu0 }
 0x2d6   : > { %1251 = vst.msk [vmem:[%s1851_s15 + $0xd0] sm:$0xff] %vm1224_vm6, %v1547_v1  ;;  %v1193_v2 = vpop.f32.mrb[41].mxu0 }
 0x2d7   : > { %1249 = vst.msk [vmem:[%s1851_s15 + $0xc0] sm:$0xff] %vm1224_vm6, %v1193_v2  ;;  %v1548_v3 = vpop.f32.mrb[42].mxu0 }
 0x2d8   : > { %1252 = vst.msk [vmem:[%s1851_s15 + $0xd8] sm:$0xff] %vm1224_vm6, %v1548_v3  ;;  %v1196_v4 = vpop.f32.mrb[43].mxu0 }
 0x2d9   : > { %1250 = vst.msk [vmem:[%s1851_s15 + $0xc8] sm:$0xff] %vm1224_vm6, %v1196_v4 }
 0x2dd   : > { %v1551_v5 = vpop.f32.mrb[44].mxu0 }
 0x2de   : > { %1255 = vst.msk [vmem:[%s1851_s15 + $0xf0] sm:$0xff] %vm1224_vm6, %v1551_v5  ;;  %v1209_v6 = vpop.f32.mrb[45].mxu0 }
 0x2df   : > { %1253 = vst.msk [vmem:[%s1851_s15 + $0xe0] sm:$0xff] %vm1224_vm6, %v1209_v6  ;;  %v1552_v7 = vpop.f32.mrb[46].mxu0 }
 0x2e0   : > { %1256 = vst.msk [vmem:[%s1851_s15 + $0xf8] sm:$0xff] %vm1224_vm6, %v1552_v7  ;;  %v1212_v8 = vpop.f32.mrb[47].mxu0 }
 0x2e1   : > { %1254 = vst.msk [vmem:[%s1851_s15 + $0xe8] sm:$0xff] %vm1224_vm6, %v1212_v8 }
 0x2e2 PF: > { %s16_s21 = sadd.s32 1, %s1583_s21  }
 0x2e3   : > { %p13_p4 = scmp.ge.s32.totalorder %s16_s21, 4  }
 0x2e5   :  { %15 = sbr.rel (!%p13_p4) target bundleno = 1 (0x1), region = 74 }

</bundles_post_ra>
